<compile_context>
chip_gen: v7x
topology: tpu7x:2x2x1
jax: 0.10.0
libtpu: 0.0.40
codegen_flags: <defaults>
</compile_context>

<pallas_src>
import jax
import jax.numpy as jnp
from jax.experimental import pallas as pl
from jax.experimental.pallas import tpu as pltpu

_LANE = 128  # TPU vreg lane width


def _qnet_kernel(x_ref, w1b1_ref, w2b2_ref, out_ref):
    """Fused 2-layer MLP:  out = relu(x @ W1 + b1) @ W2 + b2.

    x_ref:    [TB, I]
    w1b1_ref: [I+1, H]    rows 0..I-1 = W1,  row I = b1
    w2b2_ref: [H+1, Op]   rows 0..H-1 = W2,  row H = b2  (Op = O padded to 128)
    out_ref:  [TB, Op]
    """
    num_in = w1b1_ref.shape[0] - 1
    num_hidden = w2b2_ref.shape[0] - 1

    w1b1 = w1b1_ref[...]
    h = jnp.dot(x_ref[...], w1b1[:num_in, :],
                preferred_element_type=jnp.float32)
    h = jnp.maximum(h + w1b1[num_in:, :], 0.0)          # bias add + ReLU (VPU)

    w2b2 = w2b2_ref[...]
    y = jnp.dot(h.astype(w2b2.dtype), w2b2[:num_hidden, :],
                preferred_element_type=jnp.float32)
    out_ref[...] = (y + w2b2[num_hidden:, :]).astype(out_ref.dtype)


def pack_params(w1, b1, w2, b2):
    """Fold biases into weight slabs and lane-pad the output features.

    Returns:
      w1b1: [I+1, H]   rows 0..I-1 = W1, row I = b1
      w2b2: [H+1, Op]  rows 0..H-1 = W2, row H = b2, Op = max(128, ceil128(O))
    """
    in_features, hidden = w1.shape
    hidden2, out_features = w2.shape
    assert hidden == hidden2
    o_pad = max(_LANE, ((out_features + _LANE - 1) // _LANE) * _LANE)
    w1b1 = jnp.concatenate([w1, b1.reshape(1, hidden)], axis=0)
    w2_p = jnp.pad(w2, ((0, 0), (0, o_pad - out_features)))
    b2_p = jnp.pad(b2.reshape(1, out_features),
                   ((0, 0), (0, o_pad - out_features)))
    w2b2 = jnp.concatenate([w2_p, b2_p], axis=0)
    return w1b1, w2b2


def linear_qnet_forward(x, w1b1, w2b2, out_features, *, block_batch=256):
    """x: [B, I]; w1b1: [I+1, H]; w2b2: [H+1, O_pad] -> [B, out_features]."""
    batch, in_features = x.shape
    in_p1, hidden = w1b1.shape
    hid_p1, o_pad = w2b2.shape
    assert in_p1 == in_features + 1 and hid_p1 == hidden + 1

    tb = min(block_batch, batch)          # batch tile (full batch if small)
    grid = (pl.cdiv(batch, tb),)

    out_padded = pl.pallas_call(
        _qnet_kernel,
        out_shape=jax.ShapeDtypeStruct((batch, o_pad), jnp.float32),
        grid_spec=pltpu.PrefetchScalarGridSpec(
            num_scalar_prefetch=0,
            grid=grid,
            in_specs=[
                # x tile marches over the batch; weight slabs stay VMEM-resident.
                pl.BlockSpec((tb, in_features), lambda i: (i, 0),
                             memory_space=pltpu.MemorySpace.VMEM),
                pl.BlockSpec((in_p1, hidden), lambda i: (0, 0),
                             memory_space=pltpu.MemorySpace.VMEM),
                pl.BlockSpec((hid_p1, o_pad), lambda i: (0, 0),
                             memory_space=pltpu.MemorySpace.VMEM),
            ],
            out_specs=pl.BlockSpec((tb, o_pad), lambda i: (i, 0),
                                   memory_space=pltpu.MemorySpace.VMEM),
        ),
        compiler_params=pltpu.CompilerParams(
            dimension_semantics=("parallel",)),
    )(x, w1b1, w2b2)
    return out_padded[:, :out_features]


def init_params(key, input_size, hidden_size, output_size):
    """Deterministic init mimicking nn.Linear's U(-1/sqrt(fan_in), 1/sqrt(fan_in))."""
    k1, k2, k3, k4 = jax.random.split(key, 4)
    bound1 = 1.0 / (input_size ** 0.5)
    bound2 = 1.0 / (hidden_size ** 0.5)
    # Stored already transposed to [in, out] for the kernel.
    w1 = jax.random.uniform(k1, (input_size, hidden_size), jnp.float32,
                            -bound1, bound1)
    b1 = jax.random.uniform(k2, (1, hidden_size), jnp.float32, -bound1, bound1)
    w2 = jax.random.uniform(k3, (hidden_size, output_size), jnp.float32,
                            -bound2, bound2)
    b2 = jax.random.uniform(k4, (1, output_size), jnp.float32, -bound2, bound2)
    return w1, b1, w2, b2


# TODO(synk): Linear_QNet.save() (torch.save of the state dict) is host-side
# file I/O with no Pallas equivalent; persist the packed params with numpy if
# needed.

if __name__ == "__main__":
    # Snake-game-style sizes: 11 state features -> 32 hidden -> 3 actions.
    batch, input_size, hidden_size, output_size = 8, 11, 32, 3

    key = jax.random.PRNGKey(0)
    kx, kp, kb = jax.random.split(key, 3)
    x = jax.random.normal(kx, (batch, input_size), jnp.float32)
    w1, b1, w2, b2 = init_params(kp, input_size, hidden_size, output_size)
    w1b1, w2b2 = pack_params(w1, b1, w2, b2)

    # Small (single-grid-step) forward.
    out = linear_qnet_forward(x, w1b1, w2b2, output_size)
    jax.block_until_ready(out)
    ref = jnp.maximum(x @ w1 + b1, 0.0) @ w2 + b2
    assert out.shape == (batch, output_size)
    assert jnp.allclose(out, ref, atol=1e-5, rtol=1e-5)

    # Replay-buffer-sized batch: exercises the batch grid (3 steps, ragged
    # last block) with VMEM-resident weights and "parallel" semantics.
    big_batch = 300
    xb = jax.random.normal(kb, (big_batch, input_size), jnp.float32)
    out_b = linear_qnet_forward(xb, w1b1, w2b2, output_size, block_batch=128)
    jax.block_until_ready(out_b)
    ref_b = jnp.maximum(xb @ w1 + b1, 0.0) @ w2 + b2
    assert out_b.shape == (big_batch, output_size)
    assert jnp.allclose(out_b, ref_b, atol=1e-5, rtol=1e-5)

    print("KERNEL_OK")
</pallas_src>

<mosaic_0001>
module attributes {stable_mosaic.version = 11 : i64} {
  func.func @_qnet_kernel(%arg0: i32, %arg1: memref<8x11xf32, #tpu.memory_space<vmem>>, %arg2: memref<12x32xf32, #tpu.memory_space<vmem>>, %arg3: memref<33x128xf32, #tpu.memory_space<vmem>>, %arg4: memref<8x128xf32, #tpu.memory_space<vmem>>) attributes {dimension_semantics = [#tpu.dimension_semantics<parallel>], iteration_bounds = array<i64: 1>, scalar_prefetch = 0 : i64, scratch_operands = 0 : i64, tpu.core_type = #tpu.core_type<tc>, window_params = [{transform_indices = @transform_0, window_bounds = array<i64: 8, 11>}, {pipeline_mode = #tpu.pipeline_mode<synchronous>, transform_indices = @transform_1, window_bounds = array<i64: 12, 32>}, {pipeline_mode = #tpu.pipeline_mode<synchronous>, transform_indices = @transform_2, window_bounds = array<i64: 33, 128>}, {transform_indices = @transform_3, window_bounds = array<i64: 8, 128>}]} {
    %c0 = arith.constant 0 : index
    %c0_0 = arith.constant 0 : index
    %0 = vector.load %arg2[%c0, %c0_0] : memref<12x32xf32, #tpu.memory_space<vmem>>, vector<12x32xf32>
    %c0_1 = arith.constant 0 : index
    %c0_2 = arith.constant 0 : index
    %1 = vector.load %arg1[%c0_1, %c0_2] : memref<8x11xf32, #tpu.memory_space<vmem>>, vector<8x11xf32>
    %2 = vector.extract_strided_slice %0 {offsets = [0, 0], sizes = [11, 32], strides = [1, 1]} : vector<12x32xf32> to vector<11x32xf32>
    %cst = arith.constant dense<0.000000e+00> : vector<8x32xf32>
    %3 = tpu.matmul %1, %2, %cst {dimension_numbers = #tpu.dot_dimension_numbers<[1], [0], [0], [1], [0, 0, 1, 1], [], []>} : vector<8x11xf32>, vector<11x32xf32>, vector<8x32xf32> -> vector<8x32xf32>
    %4 = vector.extract_strided_slice %0 {offsets = [11, 0], sizes = [1, 32], strides = [1, 1]} : vector<12x32xf32> to vector<1x32xf32>
    %5 = vector.broadcast %4 : vector<1x32xf32> to vector<8x32xf32>
    %6 = arith.addf %3, %5 : vector<8x32xf32>
    %cst_3 = arith.constant 0.000000e+00 : f32
    %7 = vector.broadcast %cst_3 : f32 to vector<8x32xf32>
    %8 = arith.maximumf %6, %7 : vector<8x32xf32>
    %c0_4 = arith.constant 0 : index
    %c0_5 = arith.constant 0 : index
    %9 = vector.load %arg3[%c0_4, %c0_5] : memref<33x128xf32, #tpu.memory_space<vmem>>, vector<33x128xf32>
    %10 = vector.extract_strided_slice %9 {offsets = [0, 0], sizes = [32, 128], strides = [1, 1]} : vector<33x128xf32> to vector<32x128xf32>
    %cst_6 = arith.constant dense<0.000000e+00> : vector<8x128xf32>
    %11 = tpu.matmul %8, %10, %cst_6 {dimension_numbers = #tpu.dot_dimension_numbers<[1], [0], [0], [1], [0, 0, 1, 1], [], []>} : vector<8x32xf32>, vector<32x128xf32>, vector<8x128xf32> -> vector<8x128xf32>
    %12 = vector.extract_strided_slice %9 {offsets = [32, 0], sizes = [1, 128], strides = [1, 1]} : vector<33x128xf32> to vector<1x128xf32>
    %13 = vector.broadcast %12 : vector<1x128xf32> to vector<8x128xf32>
    %14 = arith.addf %11, %13 : vector<8x128xf32>
    %c0_7 = arith.constant 0 : index
    %c0_8 = arith.constant 0 : index
    %15 = vector.load %arg4[%c0_7, %c0_8] : memref<8x128xf32, #tpu.memory_space<vmem>>, vector<8x128xf32>
    tpu.vector_store %arg4[%c0_7, %c0_8], %14 {strides = array<i32>} : memref<8x128xf32, #tpu.memory_space<vmem>>, vector<8x128xf32>,
    return
  }
  func.func @transform_0(%arg0: i32) -> (i32, i32) {
    %c0_i32 = arith.constant 0 : i32
    %c0_i32_0 = arith.constant 0 : i32
    return %arg0, %c0_i32 : i32, i32
  }
  func.func @transform_1(%arg0: i32) -> (i32, i32) {
    %c0_i32 = arith.constant 0 : i32
    %c0_i32_0 = arith.constant 0 : i32
    %c0_i32_1 = arith.constant 0 : i32
    return %c0_i32, %c0_i32_0 : i32, i32
  }
  func.func @transform_2(%arg0: i32) -> (i32, i32) {
    %c0_i32 = arith.constant 0 : i32
    %c0_i32_0 = arith.constant 0 : i32
    %c0_i32_1 = arith.constant 0 : i32
    return %c0_i32, %c0_i32_0 : i32, i32
  }
  func.func @transform_3(%arg0: i32) -> (i32, i32) {
    %c0_i32 = arith.constant 0 : i32
    %c0_i32_0 = arith.constant 0 : i32
    return %arg0, %c0_i32 : i32, i32
  }
}

</mosaic_0001>

<bundles_post_ra>
// kernel: tpu_custom_call.1
= control target key start
LH: loop header
LB: loop body
LE: loop exit
PB: predicated region body
PF: predicated region fallthrough
CT: control target
= control target key end

     0   :  { %8 = vsyncpa [#allocation3], 0  ;;  %s468_s0 = inlined_call_operand.hbm [shape: f32[8,11], index: 0, kind: input, shape index: {}]   ;;  %s469_s1 = inlined_call_operand.hbm [shape: f32[12,32], index: 1, kind: input, shape index: {}]   ;;  %s470_s2 = inlined_call_operand.hbm [shape: f32[33,128], index: 2, kind: input, shape index: {}]   ;;  %s471_s3 = inlined_call_operand.hbm [shape: f32[8,128], index: 3, kind: output, shape index: {}]  }
   0x1   :  { %9 = vsyncpa [#allocation6], 0 }
   0x2   :  { %10 = vsyncpa [#allocation4], 0  ;;  %s384_s12 = smov [#allocation5]   ;;  %s290_s16 = scalar_lea.hbm %s469_s1, 256 }
   0x3   :  { %s26_s13 = sshll.u32 %s384_s12, 4  ;;  %p291_p0 = scmp.ne.s32.totalorder %s469_s1, %s290_s16  ;;  %s27_s13 = int_to_ptr.vmem [resolvable:$true] %s26_s13 }
   0x4   :  { %p294_p1 = scmp.lt.u32.totalorder %s290_s16, %s469_s1 }
   0x6   :  { %p296_p2 = pnand %p294_p1, %p291_p0 }
   0x8   :  { %299 = shalt.err (!%p296_p2)
}
   0x9   :  { %s300_s21 = scalar_lea.vmem %s27_s13, 256  ;;  %p305_p4 = scmp.lt.s32.totalorder %s27_s13, %s27_s13 }
   0xa   :  { %p301_p3 = scmp.ne.s32.totalorder %s27_s13, %s300_s21  ;;  %p306_p5 = scmp.lt.s32.totalorder %s300_s21, %s300_s21 }
   0xc   :  { %p307_p6 = por %p306_p5, %p305_p4 }
   0xe   :  { %p308_p7 = pnand %p307_p6, %p301_p3 }
  0x10   :  { %311 = shalt.err (!%p308_p7)
}
  0x11   :  { %s385_s22 = smov 128   ;;  %s386_s23 = smov 8  }
  0x12   :  { %32 = dma.hbm_to_vmem [thread:$0]  %s469_s1, 256, %s27_s13, [#allocation6], %s385_s22, %s385_s22, %s386_s23  }
  0x13   :  { %s387_s26 = smov [#allocation2]   ;;  %s388_s28 = smov [#allocation7]  }
  0x14   :  { %s17_s27 = sshll.u32 %s387_s26, 4  ;;  %s38_s29 = sshll.u32 %s388_s28, 4  ;;  %s18_s27 = int_to_ptr.vmem [resolvable:$true] %s17_s27  ;;  %s39_s29 = int_to_ptr.vmem [resolvable:$true] %s38_s29 }
  0x15   :  { %s312_s5 = scalar_lea.hbm %s468_s0, 128 }
  0x16   :  { %p313_p8 = scmp.ne.s32.totalorder %s468_s0, %s312_s5  ;;  %p316_p9 = scmp.lt.u32.totalorder %s312_s5, %s468_s0 }
  0x18   :  { %p318_p10 = pnand %p316_p9, %p313_p8 }
  0x1a   :  { %321 = shalt.err (!%p318_p10)
}
  0x1b   :  { %s322_s1 = scalar_lea.vmem %s18_s27, 128  ;;  %p327_p12 = scmp.lt.s32.totalorder %s18_s27, %s18_s27 }
  0x1c   :  { %p323_p11 = scmp.ne.s32.totalorder %s18_s27, %s322_s1  ;;  %p328_p13 = scmp.lt.s32.totalorder %s322_s1, %s322_s1 }
  0x1e   :  { %p329_p0 = por %p328_p13, %p327_p12 }
  0x20   :  { %p330_p1 = pnand %p329_p0, %p323_p11 }
  0x22   :  { %333 = shalt.err (!%p330_p1)
}
  0x23   :  { %20 = dma.hbm_to_vmem [thread:$0]  %s468_s0, 128, %s18_s27, [#allocation3]  }
  0x24   :  { %s334_s14 = scalar_lea.hbm %s470_s2, 640 }
  0x25   :  { %p335_p2 = scmp.ne.s32.totalorder %s470_s2, %s334_s14  ;;  %p338_p3 = scmp.lt.u32.totalorder %s334_s14, %s470_s2 }
  0x27   :  { %p340_p4 = pnand %p338_p3, %p335_p2 }
  0x29   :  { %343 = shalt.err (!%p340_p4)
}
  0x2a   :  { %s344_s19 = scalar_lea.vmem %s39_s29, 640  ;;  %p349_p6 = scmp.lt.s32.totalorder %s39_s29, %s39_s29 }
  0x2b   :  { %p345_p5 = scmp.ne.s32.totalorder %s39_s29, %s344_s19  ;;  %p350_p7 = scmp.lt.s32.totalorder %s344_s19, %s344_s19 }
  0x2d   :  { %p351_p8 = por %p350_p7, %p349_p6 }
  0x2f   :  { %p352_p9 = pnand %p351_p8, %p345_p5 }
  0x31   :  { %355 = shalt.err (!%p352_p9)
}
  0x32   :  { %44 = dma.hbm_to_vmem [thread:$0]  %s470_s2, 640, %s39_s29, [#allocation6], %s385_s22, %s385_s22, %s386_s23  }
  0x33   :  { %378 = dma.done.wait [#allocation3], 128  }
  0x34   :  { %379 = vsyncadd [#allocation3], 4294967168 }
  0x35   :  { %380 = dma.done.wait [#allocation6], 896  }
  0x36   :  { %381 = vsyncadd [#allocation6], 4294966400  ;;  %v389_v0 = vmov 0.0|0.0   ;;  %vm390_vm0 = vmmov 0   ;;  %v391_v1 = vmov 0.0   ;;  %vm65_vm1 = vcmask 1042432  }
  0x37   :  { %270 = vmatprep.subr.bf16.mxu0 %v389_v0  ;;  %274 = vmatprep.subr.bf16.mxu1 %v389_v0  ;;  %v54_v2 = vld [vmem:[#allocation5] sm:$0xff]  ;;  %v55_v3 = vld [vmem:[#allocation5 + $0x8] sm:$0xf]  ;;  %vm392_vm2 = vmmov 1   ;;  %v140_v5 = vld [vmem:[#allocation7] sm:$0xff]  ;;  %vm61_vm4 = vcmask 89088   ;;  %v57_v12 = vlaneseq }
  0x38   :  { %256 = vmatprep.mubr.msk.f32.mxu0 %vm390_vm0, %v391_v1  ;;  %267 = vmatprep.mubr.msk.f32.mxu1 %vm390_vm0, %v391_v1  ;;  %vm272_vm3 = vmpackc.low %vm65_vm1, %vm392_vm2  ;;  %v271_v4 = vpack.c.bf16 %v55_v3, %v54_v2  ;;  %v141_v6 = vld [vmem:[#allocation7 + $0x8] sm:$0xff]  ;;  %v142_v9 = vld [vmem:[#allocation7 + $0x10] sm:$0xff]  ;;  %vm149_vm5 = vcmask 261120   ;;  %s393_s2 = smov [#allocation8]  }
  0x39   :  { %v275_v7 = vpack.c.bf16 %v141_v6, %v140_v5  ;;  %v56_v8 = vld [vmem:[#allocation2] sm:$0xff]  ;;  %v143_v10 = vld [vmem:[#allocation7 + $0x18] sm:$0xff]  ;;  %v58_v13 = vshrl.u32 %v57_v12, 7  ;;  %v242_v20 = vld [vmem:[#allocation7 + $0x20] ss:$0 sm:$0xff]  ;;  %s230_s21 = sshll.u32 %s393_s2, 4  ;;  %s231_s21 = int_to_ptr.vmem [resolvable:$true] %s230_s21 }
  0x3a   :  { %273 = vmatpush3.bf16.msk.msra.mxu0 %vm272_vm3, %v271_v4  ;;  %v278_v11 = vpack.c.bf16 %v143_v10, %v142_v9  ;;  %s356_s22 = scalar_lea.vmem %s231_s21, 128  ;;  %p361_p11 = scmp.lt.s32.totalorder %s231_s21, %s231_s21 }
  0x3b   :  { %276 = vmatpush3.bf16.msra.mxu1 %v275_v7  ;;  %v59_v14 = vsub.s32 3, %v58_v13  ;;  %p357_p10 = scmp.ne.s32.totalorder %s231_s21, %s356_s22  ;;  %p362_p12 = scmp.lt.s32.totalorder %s356_s22, %s356_s22 }
  0x3c   :  { %277 = vmatprep.subr.bf16.mxu1 %v389_v0 }
  0x3d   :  { %257 = vmatmul.mubr.msk.f32.vlgmr.msra.gmra.mrb[0].mxu0 %vm61_vm4, %v56_v8  ;;  %v60_v15 = vrot.slane %v55_v3, %v59_v14  ;;  %p363_p13 = por %p362_p12, %p361_p11 }
  0x3f   :  { %279 = vmatpush3.bf16.msra.mxu1 %v278_v11  ;;  %p364_p0 = pnand %p363_p13, %p357_p10 }
 0x110   :  { %v135_v16 = vpop.f32.mrb[0].mxu0 }
 0x111   :  { %v136_v17 = vadd.f32 %v135_v16, %v60_v15  ;;  %v258_v18 = vpop.f32.mrb[1].mxu0 }
 0x113   :  { %v139_v19 = vmax.f32 %v136_v17, 0.0 }
 0x115   :  { %268 = vmatmul.mubr.msk.f32.vlgmr.msra.gmra.mrb[0].mxu1 %vm149_vm5, %v139_v19 }
 0x1e8   :  { %v219_v21 = vpop.f32.mrb[0].mxu1 }
 0x1e9   :  { %v220_v22 = vadd.f32 %v242_v20, %v219_v21  ;;  %v269_v23 = vpop.f32.mrb[1].mxu1 }
 0x1eb   :  { %223 = vst [vmem:[#allocation8] sm:$0xff] %v220_v22 }
 0x1ec   :  { %367 = shalt.err (!%p364_p0)
}
 0x1ed   :  { %s368_s25 = scalar_lea.hbm %s471_s3, 128 }
 0x1ee   :  { %p369_p1 = scmp.ne.s32.totalorder %s471_s3, %s368_s25  ;;  %p372_p2 = scmp.lt.u32.totalorder %s368_s25, %s471_s3 }
 0x1f0   :  { %p374_p3 = pnand %p372_p2, %p369_p1 }
 0x1f2   :  { %377 = shalt.err (!%p374_p3)
}
 0x1f3   :  { %233 = dma.vmem_to_hbm [thread:$0]  %s231_s21, 128, %s471_s3, [#allocation4]  }
 0x1f4   :  { %382 = dma.done.wait [#allocation4], 128  }
 0x1f5   :  { %383 = vsyncadd [#allocation4], 4294967168 }
 0x1f6   :  { %237 = vsyncpa [#allocation3], 1 }
 0x1f7   :  { %238 = vsyncpa [#allocation6], 1 }
 0x1f8   :  { %239 = vsyncpa [#allocation4], 1 }

</bundles_post_ra>
